<compile_context>
chip_gen: v6e
topology: v6e:2x2x1
jax: 0.10.0
libtpu: 0.0.40
codegen_flags: <defaults>
</compile_context>

<pallas_src>
import functools

import jax
import jax.numpy as jnp
import numpy as np
from jax.experimental import pallas as pl
from jax.experimental.pallas import tpu as pltpu

_VMEM_LIMIT = 40 * 1024 * 1024              # safe under v7x's 64 MiB/TC physical VMEM
_RESIDENT_SUPPORT_BYTES = 8 * 1024 * 1024   # x2 double-buffer ~= 16 MiB worst case
_N_QUANTUM = 256                            # node-count padding quantum
_TM_CAP = 512                               # adj row-tile cap
_TK_CAP = 1024                              # adj K-tile cap (2 KiB contiguous bf16 rows)


def _round_up(a, b):
    return ((a + b - 1) // b) * b


def _pick_tile(n_pad, cap):
    """Largest multiple of 128 that divides n_pad and is <= cap."""
    for t in range(cap, 127, -128):
        if n_pad % t == 0:
            return t
    return 128


# --------------------------------------------------------------------------
# Kernel 1: feature transform  s1 = x @ W1   (bf16 in, bf16 out, f32 acc)
# --------------------------------------------------------------------------
def _feature_transform_kernel(x_ref, w_ref, out_ref):
    out_ref[...] = jnp.dot(
        x_ref[...], w_ref[...], preferred_element_type=jnp.float32
    ).astype(out_ref.dtype)


def _feature_transform(x_p, w_p, *, tm):
    n_pad, fin = x_p.shape
    fout = w_p.shape[1]
    return pl.pallas_call(
        _feature_transform_kernel,
        out_shape=jax.ShapeDtypeStruct((n_pad, fout), jnp.bfloat16),
        grid_spec=pltpu.PrefetchScalarGridSpec(
            num_scalar_prefetch=0,
            grid=(n_pad // tm,),
            in_specs=[
                pl.BlockSpec((tm, fin), lambda i: (i, 0)),
                pl.BlockSpec((fin, fout), lambda i: (0, 0)),  # W1 small: resident
            ],
            out_specs=pl.BlockSpec((tm, fout), lambda i: (i, 0)),
        ),
        compiler_params=pltpu.CompilerParams(
            dimension_semantics=("parallel",),
            vmem_limit_bytes=_VMEM_LIMIT,
        ),
    )(x_p, w_p)


# --------------------------------------------------------------------------
# Kernel 2: aggregation  out = finalize( adj @ support + b )
#   grid = (row tiles [parallel], adj-K tiles [arbitrary]); f32 accumulator.
#   finalize is either  relu(.) @ W_next  (fused gc1 -> s2, never writes h)
#   or a masked log_softmax (gc2 output).
# --------------------------------------------------------------------------
def _make_aggregate_kernel(*, fuse_w_next, activation, nvalid, resident_support, tk):
    def kernel(*refs):
        if fuse_w_next:
            adj_ref, sup_ref, b_ref, wn_ref, out_ref, acc_ref = refs
        else:
            adj_ref, sup_ref, b_ref, out_ref, acc_ref = refs

        k = pl.program_id(1)

        @pl.when(k == 0)
        def _():
            acc_ref[...] = jnp.zeros_like(acc_ref)

        if resident_support:
            # Support lives fully in VMEM (loaded once); slice its k-block.
            start = pl.multiple_of(k * tk, 128)
            sup_blk = sup_ref[pl.ds(start, tk), :]
        else:
            sup_blk = sup_ref[...]

        # bf16 x bf16 MXU matmul, f32 accumulation.
        acc_ref[...] += jnp.dot(
            adj_ref[...], sup_blk, preferred_element_type=jnp.float32
        )

        @pl.when(k == pl.num_programs(1) - 1)
        def _():
            z = acc_ref[...] + b_ref[...]
            if activation == "relu":
                h = jnp.maximum(z, 0.0)
                if fuse_w_next:
                    # Fused second feature transform: s2_tile = relu(...) @ W2
                    out_ref[...] = jnp.dot(
                        h.astype(jnp.bfloat16), wn_ref[...],
                        preferred_element_type=jnp.float32,
                    ).astype(out_ref.dtype)
                else:
                    out_ref[...] = h.astype(out_ref.dtype)
            else:  # masked log_softmax over the first `nvalid` (real) class lanes
                col = jax.lax.broadcasted_iota(jnp.int32, z.shape, 1)
                zm = jnp.where(col < nvalid, z, -jnp.inf)
                m = jnp.max(zm, axis=-1, keepdims=True)
                lse = m + jnp.log(jnp.sum(jnp.exp(zm - m), axis=-1, keepdims=True))
                # Padded class lanes are written as 0.0 (sliced off in wrapper).
                out_ref[...] = jnp.where(col < nvalid, z - lse, 0.0).astype(out_ref.dtype)

    return kernel


def _aggregate(adj_p, sup_p, b_p, w_next=None, *, activation, nvalid=None,
               out_dtype, tm, tk):
    n_pad = adj_p.shape[0]
    fout = sup_p.shape[1]
    out_cols = w_next.shape[1] if w_next is not None else fout
    ni, nk = n_pad // tm, n_pad // tk

    sup_bytes = n_pad * fout * sup_p.dtype.itemsize
    resident_support = sup_bytes <= _RESIDENT_SUPPORT_BYTES

    in_specs = [pl.BlockSpec((tm, tk), lambda i, k: (i, k))]             # adj (streamed)
    if resident_support:
        in_specs.append(pl.BlockSpec((n_pad, fout), lambda i, k: (0, 0)))  # resident support
    else:
        in_specs.append(pl.BlockSpec((tk, fout), lambda i, k: (k, 0)))     # streamed k-blocks
    in_specs.append(pl.BlockSpec((1, fout), lambda i, k: (0, 0)))        # bias (resident)
    args = [adj_p, sup_p, b_p]
    if w_next is not None:
        in_specs.append(pl.BlockSpec(w_next.shape, lambda i, k: (0, 0)))  # W2 (resident)
        args.append(w_next)

    flops = 2 * n_pad * n_pad * fout
    if w_next is not None:
        flops += 2 * n_pad * fout * out_cols
    sup_traffic = sup_bytes if resident_support else ni * sup_bytes
    bytes_accessed = int(
        n_pad * n_pad * adj_p.dtype.itemsize
        + sup_traffic
        + n_pad * out_cols * jnp.dtype(out_dtype).itemsize
    )

    kernel = _make_aggregate_kernel(
        fuse_w_next=w_next is not None, activation=activation, nvalid=nvalid,
        resident_support=resident_support, tk=tk)

    return pl.pallas_call(
        kernel,
        out_shape=jax.ShapeDtypeStruct((n_pad, out_cols), out_dtype),
        grid_spec=pltpu.PrefetchScalarGridSpec(
            num_scalar_prefetch=0,
            grid=(ni, nk),
            in_specs=in_specs,
            out_specs=pl.BlockSpec((tm, out_cols), lambda i, k: (i, 0)),
            scratch_shapes=[pltpu.VMEM((tm, fout), jnp.float32)],
        ),
        compiler_params=pltpu.CompilerParams(
            dimension_semantics=("parallel", "arbitrary"),
            vmem_limit_bytes=_VMEM_LIMIT,
        ),
        cost_estimate=pl.CostEstimate(
            flops=flops,
            transcendentals=(n_pad * fout if activation == "log_softmax" else 0),
            bytes_accessed=bytes_accessed,
        ),
    )(*args)


# --------------------------------------------------------------------------
# Wrapper: pad/cast hoisted into prepare_gcn_inputs (do once, reuse per call)
# --------------------------------------------------------------------------
def prepare_gcn_inputs(x, adj, w1, b1, w2, b2):
    """Pad + cast everything once. Reuse the result across forward calls —
    the adj pad/cast is itself a full HBM pass and must not be per-call."""
    n, nfeat = x.shape
    nhid = w1.shape[1]
    nclass = w2.shape[1]

    n_pad = _round_up(n, _N_QUANTUM)
    f_pad = _round_up(max(nfeat, 128), 128)   # lane-dense feature K dim
    h_pad = _round_up(max(nhid, 128), 128)    # hidden width (128 lanes min)
    c_pad = _round_up(max(nclass, 128), 128)  # class width (128 lanes min)

    x_p = jnp.zeros((n_pad, f_pad), jnp.bfloat16).at[:n, :nfeat].set(x.astype(jnp.bfloat16))
    adj_p = jnp.zeros((n_pad, n_pad), jnp.bfloat16).at[:n, :n].set(adj.astype(jnp.bfloat16))
    w1_p = jnp.zeros((f_pad, h_pad), jnp.bfloat16).at[:nfeat, :nhid].set(w1.astype(jnp.bfloat16))
    b1_p = jnp.zeros((1, h_pad), jnp.float32).at[:, :nhid].set(b1.reshape(1, -1))
    w2_p = jnp.zeros((h_pad, c_pad), jnp.bfloat16).at[:nhid, :nclass].set(w2.astype(jnp.bfloat16))
    b2_p = jnp.zeros((1, c_pad), jnp.float32).at[:, :nclass].set(b2.reshape(1, -1))

    return dict(n=n, nclass=nclass, x=x_p, adj=adj_p,
                w1=w1_p, b1=b1_p, w2=w2_p, b2=b2_p)


def gcn_aux_forward_prepared(prep):
    """GCNAux.forward() on pre-padded / pre-cast inputs."""
    adj_p = prep["adj"]
    n_pad = adj_p.shape[0]
    tm = _pick_tile(n_pad, _TM_CAP)
    tk = _pick_tile(n_pad, _TK_CAP)

    # gc1 feature transform:  s1 = x @ W1
    s1 = _feature_transform(prep["x"], prep["w1"], tm=tm)

    # gc1 aggregate + ReLU with h @ W2 fused into the finalize:
    #   s2 = relu(adj @ s1 + b1) @ W2      (h never written to HBM)
    # Dropout between gc1 and gc2 is identity in eval mode.
    s2 = _aggregate(adj_p, s1, prep["b1"], w_next=prep["w2"],
                    activation="relu", out_dtype=jnp.bfloat16, tm=tm, tk=tk)

    # gc2 aggregate + bias + masked log_softmax:  out = log_softmax(adj @ s2 + b2)
    z = _aggregate(adj_p, s2, prep["b2"],
                   activation="log_softmax", nvalid=prep["nclass"],
                   out_dtype=jnp.float32, tm=tm, tk=tk)

    return z[:prep["n"], :prep["nclass"]]


def gcn_aux_forward(x, adj, w1, b1, w2, b2):
    """Convenience one-shot path (prepare + forward)."""
    return gcn_aux_forward_prepared(prepare_gcn_inputs(x, adj, w1, b1, w2, b2))


# --------------------------------------------------------------------------
# Parameter init (matches GraphConvolution.reset_parameters) and f32 reference
# --------------------------------------------------------------------------
def init_gc_params(key, in_features, out_features):
    stdv = 1.0 / np.sqrt(out_features)
    kw, kb = jax.random.split(key)
    w = jax.random.uniform(kw, (in_features, out_features), jnp.float32, -stdv, stdv)
    b = jax.random.uniform(kb, (1, out_features), jnp.float32, -stdv, stdv)
    return w, b


def reference_forward(x, adj, w1, b1, w2, b2):
    h = jnp.maximum(adj @ (x @ w1) + b1, 0.0)
    z = adj @ (h @ w2) + b2
    return jax.nn.log_softmax(z, axis=1)


if __name__ == "__main__":
    # Small synthetic graph: N nodes (not a tile multiple, exercises padding),
    # nfeat input features, nhid hidden, nclass classes.
    N, nfeat, nhid, nclass = 200, 32, 32, 8

    key = jax.random.PRNGKey(0)
    kx, kadj, k1, k2 = jax.random.split(key, 4)

    # Node features.
    x = jax.random.normal(kx, (N, nfeat), jnp.float32)

    # Symmetric normalized adjacency D^-1/2 (A+I) D^-1/2, as a GCN receives.
    a_raw = (jax.random.uniform(kadj, (N, N)) < 0.3).astype(jnp.float32)
    a_sym = jnp.maximum(a_raw, a_raw.T) + jnp.eye(N, dtype=jnp.float32)
    deg = jnp.sum(a_sym, axis=1)
    d_inv_sqrt = 1.0 / jnp.sqrt(deg)
    adj = a_sym * d_inv_sqrt[:, None] * d_inv_sqrt[None, :]

    # gc1 / gc2 parameters (aux layer / B / e are only used by loss(), not forward()).
    w1, b1 = init_gc_params(k1, nfeat, nhid)
    w2, b2 = init_gc_params(k2, nhid, nclass)

    # Pad/cast hoisted: prepare once, reuse across calls.
    prep = prepare_gcn_inputs(x, adj, w1, b1, w2, b2)
    prep = jax.tree_util.tree_map(
        lambda a: jax.block_until_ready(a) if isinstance(a, jax.Array) else a, prep)

    out = gcn_aux_forward_prepared(prep)
    out = jax.block_until_ready(out)

    ref = reference_forward(x, adj, w1, b1, w2, b2)
    # bf16 MXU operands (f32 accumulation) -> loosen tolerance vs f32 reference.
    np.testing.assert_allclose(np.asarray(out), np.asarray(ref), rtol=5e-2, atol=5e-2)
    assert out.shape == (N, nclass)

    print("KERNEL_OK")
</pallas_src>

<mosaic_0001>
module attributes {stable_mosaic.version = 11 : i64} {
  func.func @_feature_transform_kernel(%arg0: i32, %arg1: memref<256x128xbf16, #tpu.memory_space<vmem>>, %arg2: memref<128x128xbf16, #tpu.memory_space<vmem>>, %arg3: memref<256x128xbf16, #tpu.memory_space<vmem>>) attributes {dimension_semantics = [#tpu.dimension_semantics<parallel>], iteration_bounds = array<i64: 1>, scalar_prefetch = 0 : i64, scratch_operands = 0 : i64, tpu.core_type = #tpu.core_type<tc>, window_params = [{transform_indices = @transform_0, window_bounds = array<i64: 256, 128>}, {pipeline_mode = #tpu.pipeline_mode<synchronous>, transform_indices = @transform_1, window_bounds = array<i64: 128, 128>}, {transform_indices = @transform_2, window_bounds = array<i64: 256, 128>}]} {
    %c0 = arith.constant 0 : index
    %c0_0 = arith.constant 0 : index
    %0 = vector.load %arg1[%c0, %c0_0] : memref<256x128xbf16, #tpu.memory_space<vmem>>, vector<256x128xbf16>
    %c0_1 = arith.constant 0 : index
    %c0_2 = arith.constant 0 : index
    %1 = vector.load %arg2[%c0_1, %c0_2] : memref<128x128xbf16, #tpu.memory_space<vmem>>, vector<128x128xbf16>
    %cst = arith.constant dense<0.000000e+00> : vector<256x128xf32>
    %2 = tpu.matmul %0, %1, %cst {dimension_numbers = #tpu.dot_dimension_numbers<[1], [0], [0], [1], [0, 0, 1, 1], [], []>} : vector<256x128xbf16>, vector<128x128xbf16>, vector<256x128xf32> -> vector<256x128xf32>
    %3 = arith.truncf %2 : vector<256x128xf32> to vector<256x128xbf16>
    %c0_3 = arith.constant 0 : index
    %c0_4 = arith.constant 0 : index
    %4 = vector.load %arg3[%c0_3, %c0_4] : memref<256x128xbf16, #tpu.memory_space<vmem>>, vector<256x128xbf16>
    tpu.vector_store %arg3[%c0_3, %c0_4], %3 {strides = array<i32>} : memref<256x128xbf16, #tpu.memory_space<vmem>>, vector<256x128xbf16>,
    return
  }
  func.func @transform_0(%arg0: i32) -> (i32, i32) {
    %c0_i32 = arith.constant 0 : i32
    %c0_i32_0 = arith.constant 0 : i32
    return %arg0, %c0_i32 : i32, i32
  }
  func.func @transform_1(%arg0: i32) -> (i32, i32) {
    %c0_i32 = arith.constant 0 : i32
    %c0_i32_0 = arith.constant 0 : i32
    %c0_i32_1 = arith.constant 0 : i32
    return %c0_i32, %c0_i32_0 : i32, i32
  }
  func.func @transform_2(%arg0: i32) -> (i32, i32) {
    %c0_i32 = arith.constant 0 : i32
    %c0_i32_0 = arith.constant 0 : i32
    return %arg0, %c0_i32 : i32, i32
  }
}

</mosaic_0001>

<bundles_post_ra>
// kernel: tpu_custom_call.1
= control target key start
LH: loop header
LB: loop body
LE: loop exit
PB: predicated region body
PF: predicated region fallthrough
CT: control target
= control target key end

     0   :  { %7 = vsyncpa [#allocation3], 0  ;;  %s976_s0 = inlined_call_operand.hbm [shape: bf16[256,128], index: 0, kind: input, shape index: {}]   ;;  %s977_s1 = inlined_call_operand.hbm [shape: bf16[128,128], index: 1, kind: input, shape index: {}]   ;;  %s978_s2 = inlined_call_operand.hbm [shape: bf16[256,128], index: 2, kind: output, shape index: {}]  }
   0x1   :  { %8 = vsyncpa [#allocation6], 0 }
   0x2   :  { %9 = vsyncpa [#allocation4], 0  ;;  %s938_s9 = smov [#allocation2]  }
   0x3   :  { %s15_s10 = sshll.u32 %s938_s9, 4  ;;  %s16_s10 = int_to_ptr.vmem [resolvable:$true] %s15_s10 }
   0x4   :  { %s880_s11 = scalar_lea.vmem %s16_s10, 2048  ;;  %p885_p1 = scmp.lt.s32.totalorder %s16_s10, %s16_s10 }
   0x5   :  { %p881_p0 = scmp.ne.s32.totalorder %s16_s10, %s880_s11  ;;  %p886_p2 = scmp.lt.s32.totalorder %s880_s11, %s880_s11 }
   0x7   :  { %p887_p3 = por %p886_p2, %p885_p1 }
   0x9   :  { %p888_p4 = pnand %p887_p3, %p881_p0 }
   0xb   :  { %891 = shalt.err (!%p888_p4)
}
   0xc   :  { %s939_s12 = smov 64   ;;  %s940_s13 = smov 4  }
   0xd   :  { %21 = dma.hbm_to_vmem [thread:$0]  %s976_s0, 2048, %s16_s10, [#allocation3], %s939_s12, %s939_s12, %s940_s13  }
   0xe   :  { %s941_s16 = smov [#allocation5]  }
   0xf   :  { %s27_s17 = sshll.u32 %s941_s16, 4  ;;  %s28_s17 = int_to_ptr.vmem [resolvable:$true] %s27_s17 }
  0x10   :  { %s900_s18 = scalar_lea.vmem %s28_s17, 1024  ;;  %p905_p6 = scmp.lt.s32.totalorder %s28_s17, %s28_s17 }
  0x11   :  { %p901_p5 = scmp.ne.s32.totalorder %s28_s17, %s900_s18  ;;  %p906_p7 = scmp.lt.s32.totalorder %s900_s18, %s900_s18 }
  0x13   :  { %p907_p8 = por %p906_p7, %p905_p6 }
  0x15   :  { %p908_p9 = pnand %p907_p8, %p901_p5 }
  0x17   :  { %911 = shalt.err (!%p908_p9)
}
  0x18   :  { %33 = dma.hbm_to_vmem [thread:$0]  %s977_s1, 1024, %s28_s17, [#allocation6], %s939_s12, %s939_s12, %s940_s13  }
  0x19   :  { %932 = dma.done.wait [#allocation3], 2048  }
  0x1a   :  { %933 = vsyncadd [#allocation3], 4294965248 }
  0x1b   :  { %934 = dma.done.wait [#allocation6], 1024  }
  0x1c   :  { %935 = vsyncadd [#allocation6], 4294966272  ;;  %v848_v0 = vld [vmem:[#allocation5 + $0x38] sm:$0xff]   ;;  %v849_v1 = vld [vmem:[#allocation5 + $0x30] sm:$0xff]   ;;  %s942_s0 = smov [#allocation7]  }
  0x1d   :  { %779 = vmatprep.subr.bf16.mxu0 %v848_v0  ;;  %827 = vmatprep.subr.bf16.mxu1 %v848_v0  ;;  %v850_v2 = vld [vmem:[#allocation5 + $0x28] sm:$0xff]   ;;  %v851_v3 = vld [vmem:[#allocation5 + $0x20] sm:$0xff]   ;;  %v852_v6 = vld [vmem:[#allocation5 + $0x18] sm:$0xff]   ;;  %s559_s1 = sshll.u32 %s942_s0, 4  ;;  %s560_s1 = int_to_ptr.vmem [resolvable:$true] %s559_s1 }
  0x1e   :  { %780 = vmatpush3.bf16.msra.mxu0 %v848_v0  ;;  %835 = vmatpush3.bf16.msra.mxu1 %v848_v0  ;;  %v856_v4 = vld [vmem:[#allocation2] sm:$0xff]   ;;  %v853_v7 = vld [vmem:[#allocation5 + $0x10] sm:$0xff]   ;;  %v854_v8 = vld [vmem:[#allocation5 + $0x8] sm:$0xff]   ;;  %s912_s21 = scalar_lea.vmem %s560_s1, 2048  ;;  %p917_p11 = scmp.lt.s32.totalorder %s560_s1, %s560_s1 }
  0x1f   :  { %781 = vmatprep.subr.bf16.mxu0 %v849_v1  ;;  %828 = vmatprep.subr.bf16.mxu1 %v849_v1  ;;  %v857_v5 = vld [vmem:[#allocation2 + $0x40] sm:$0xff]   ;;  %v858_v10 = vld [vmem:[#allocation2 + $0x8] sm:$0xff]   ;;  %v860_v12 = vld [vmem:[#allocation2 + $0x10] sm:$0xff]   ;;  %p913_p10 = scmp.ne.s32.totalorder %s560_s1, %s912_s21  ;;  %p918_p12 = scmp.lt.s32.totalorder %s912_s21, %s912_s21 }
  0x20   :  { %795 = vmatprep.mubr.bf16.mxu0 %v856_v4  ;;  %811 = vmatprep.mubr.bf16.mxu1 %v857_v5  ;;  %v855_v9 = vld [vmem:[#allocation5] sm:$0xff]   ;;  %v859_v11 = vld [vmem:[#allocation2 + $0x48] sm:$0xff]   ;;  %v861_v13 = vld [vmem:[#allocation2 + $0x50] sm:$0xff]  }
  0x21   :  { %v862_v14 = vld [vmem:[#allocation2 + $0x18] sm:$0xff]   ;;  %v864_v16 = vld [vmem:[#allocation2 + $0x20] sm:$0xff]   ;;  %v866_v18 = vld [vmem:[#allocation2 + $0x28] sm:$0xff]   ;;  %p919_p13 = por %p918_p12, %p917_p11 }
  0x22   :  { %782 = vmatpush3.bf16.msra.mxu0 %v849_v1  ;;  %836 = vmatpush3.bf16.msra.mxu1 %v849_v1  ;;  %v863_v15 = vld [vmem:[#allocation2 + $0x58] sm:$0xff]   ;;  %v865_v17 = vld [vmem:[#allocation2 + $0x60] sm:$0xff]   ;;  %v867_v19 = vld [vmem:[#allocation2 + $0x68] sm:$0xff]  }
  0x23   :  { %783 = vmatprep.subr.bf16.mxu0 %v850_v2  ;;  %829 = vmatprep.subr.bf16.mxu1 %v850_v2  ;;  %v868_v20 = vld [vmem:[#allocation2 + $0x30] sm:$0xff]   ;;  %v870_v22 = vld [vmem:[#allocation2 + $0x38] sm:$0xff]   ;;  %p920_p0 = pnand %p919_p13, %p913_p10 }
  0x24   :  { %v869_v21 = vld [vmem:[#allocation2 + $0x70] sm:$0xff]   ;;  %v871_v23 = vld [vmem:[#allocation2 + $0x78] sm:$0xff]  }
  0x26   :  { %784 = vmatpush3.bf16.msra.mxu0 %v850_v2  ;;  %837 = vmatpush3.bf16.msra.mxu1 %v850_v2 }
  0x27   :  { %785 = vmatprep.subr.bf16.mxu0 %v851_v3  ;;  %830 = vmatprep.subr.bf16.mxu1 %v851_v3 }
  0x2a   :  { %786 = vmatpush3.bf16.msra.mxu0 %v851_v3  ;;  %838 = vmatpush3.bf16.msra.mxu1 %v851_v3 }
  0x2b   :  { %787 = vmatprep.subr.bf16.mxu0 %v852_v6  ;;  %831 = vmatprep.subr.bf16.mxu1 %v852_v6 }
  0x2e   :  { %788 = vmatpush3.bf16.msra.mxu0 %v852_v6  ;;  %839 = vmatpush3.bf16.msra.mxu1 %v852_v6 }
  0x2f   :  { %789 = vmatprep.subr.bf16.mxu0 %v853_v7  ;;  %832 = vmatprep.subr.bf16.mxu1 %v853_v7 }
  0x32   :  { %790 = vmatpush3.bf16.msra.mxu0 %v853_v7  ;;  %840 = vmatpush3.bf16.msra.mxu1 %v853_v7 }
  0x33   :  { %791 = vmatprep.subr.bf16.mxu0 %v854_v8  ;;  %833 = vmatprep.subr.bf16.mxu1 %v854_v8 }
  0x36   :  { %792 = vmatpush3.bf16.msra.mxu0 %v854_v8  ;;  %841 = vmatpush3.bf16.msra.mxu1 %v854_v8 }
  0x37   :  { %793 = vmatprep.subr.bf16.mxu0 %v855_v9  ;;  %834 = vmatprep.subr.bf16.mxu1 %v855_v9 }
  0x3a   :  { %794 = vmatpush3.bf16.msra.mxu0 %v855_v9  ;;  %842 = vmatpush3.bf16.msra.mxu1 %v855_v9 }
  0x3d   :  { %796 = vmatmul.mubr.bf16.vlgmr.msra.gmra.mxu0 %v858_v10  ;;  %812 = vmatmul.mubr.bf16.vlgmr.msra.gmra.mxu1 %v859_v11 }
  0x3e   :  { %799 = vmatprep.mubr.bf16.mxu0 %v860_v12  ;;  %815 = vmatprep.mubr.bf16.mxu1 %v861_v13 }
  0x45   :  { %800 = vmatmul.mubr.bf16.gmra.mxu0 %v862_v14  ;;  %816 = vmatmul.mubr.bf16.gmra.mxu1 %v863_v15 }
  0x46   :  { %803 = vmatprep.mubr.bf16.mxu0 %v864_v16  ;;  %819 = vmatprep.mubr.bf16.mxu1 %v865_v17 }
  0x4d   :  { %804 = vmatmul.mubr.bf16.gmra.mxu0 %v866_v18  ;;  %820 = vmatmul.mubr.bf16.gmra.mxu1 %v867_v19 }
  0x4e   :  { %807 = vmatprep.mubr.bf16.mxu0 %v868_v20  ;;  %823 = vmatprep.mubr.bf16.mxu1 %v869_v21 }
  0x55   :  { %808 = vmatmul.mubr.bf16.gmra.mxu0 %v870_v22  ;;  %824 = vmatmul.mubr.bf16.gmra.mxu1 %v871_v23 }
  0xfd   :  { %v797_v24 = vpop.f32.mrf.mxu0  ;;  %v813_v25 = vpop.f32.mrf.mxu1 }
  0xff   :  { %v267_v26 = vpop.f32.mrf.mxu0  ;;  %v331_v27 = vpop.f32.mrf.mxu1 }
 0x101   :  { %v798_v28 = vpop.f32.mrf.mxu0  ;;  %v814_v29 = vpop.f32.mrf.mxu1 }
 0x102   :  { %v668_v30 = vpack.c.bf16 %v798_v28, %v797_v24  ;;  %v708_v31 = vpack.c.bf16 %v814_v29, %v813_v25 }
 0x103   :  { %v270_v32 = vpop.f32.mrf.mxu0  ;;  %v334_v33 = vpop.f32.mrf.mxu1 }
 0x104   :  { %740 = vst [vmem:[#allocation7 + $0x8] sm:$0xff] %v668_v30   ;;  %748 = vst [vmem:[#allocation7 + $0x48] sm:$0xff] %v708_v31   ;;  %v663_v34 = vpack.c.bf16 %v270_v32, %v267_v26  ;;  %v703_v35 = vpack.c.bf16 %v334_v33, %v331_v27 }
 0x105   :  { %v801_v36 = vpop.f32.mrf.mxu0  ;;  %v817_v37 = vpop.f32.mrf.mxu1 }
 0x106   :  { %664 = vst [vmem:[#allocation7] sm:$0xff] %v663_v34   ;;  %747 = vst [vmem:[#allocation7 + $0x40] sm:$0xff] %v703_v35  }
 0x107   :  { %v283_v38 = vpop.f32.mrf.mxu0  ;;  %v347_v39 = vpop.f32.mrf.mxu1 }
 0x109   :  { %v802_v40 = vpop.f32.mrf.mxu0  ;;  %v818_v41 = vpop.f32.mrf.mxu1 }
 0x10a   :  { %v678_v42 = vpack.c.bf16 %v802_v40, %v801_v36  ;;  %v718_v43 = vpack.c.bf16 %v818_v41, %v817_v37 }
 0x10b   :  { %v286_v44 = vpop.f32.mrf.mxu0  ;;  %v350_v45 = vpop.f32.mrf.mxu1 }
 0x10c   :  { %742 = vst [vmem:[#allocation7 + $0x18] sm:$0xff] %v678_v42   ;;  %750 = vst [vmem:[#allocation7 + $0x58] sm:$0xff] %v718_v43   ;;  %v673_v46 = vpack.c.bf16 %v286_v44, %v283_v38  ;;  %v713_v47 = vpack.c.bf16 %v350_v45, %v347_v39 }
 0x10d   :  { %v805_v48 = vpop.f32.mrf.mxu0  ;;  %v821_v49 = vpop.f32.mrf.mxu1 }
 0x10e   :  { %741 = vst [vmem:[#allocation7 + $0x10] sm:$0xff] %v673_v46   ;;  %749 = vst [vmem:[#allocation7 + $0x50] sm:$0xff] %v713_v47  }
 0x10f   :  { %v299_v50 = vpop.f32.mrf.mxu0  ;;  %v363_v51 = vpop.f32.mrf.mxu1 }
 0x111   :  { %v806_v52 = vpop.f32.mrf.mxu0  ;;  %v822_v53 = vpop.f32.mrf.mxu1 }
 0x112   :  { %v688_v54 = vpack.c.bf16 %v806_v52, %v805_v48  ;;  %v728_v55 = vpack.c.bf16 %v822_v53, %v821_v49 }
 0x113   :  { %v302_v56 = vpop.f32.mrf.mxu0  ;;  %v366_v57 = vpop.f32.mrf.mxu1 }
 0x114   :  { %744 = vst [vmem:[#allocation7 + $0x28] sm:$0xff] %v688_v54   ;;  %752 = vst [vmem:[#allocation7 + $0x68] sm:$0xff] %v728_v55   ;;  %v683_v58 = vpack.c.bf16 %v302_v56, %v299_v50  ;;  %v723_v59 = vpack.c.bf16 %v366_v57, %v363_v51 }
 0x115   :  { %v809_v60 = vpop.f32.mrf.mxu0  ;;  %v825_v61 = vpop.f32.mrf.mxu1 }
 0x116   :  { %743 = vst [vmem:[#allocation7 + $0x20] sm:$0xff] %v683_v58   ;;  %751 = vst [vmem:[#allocation7 + $0x60] sm:$0xff] %v723_v59  }
 0x117   :  { %v315_v62 = vpop.f32.mrf.mxu0  ;;  %v379_v63 = vpop.f32.mrf.mxu1 }
 0x119   :  { %v810_v0 = vpop.f32.mrf.mxu0  ;;  %v826_v1 = vpop.f32.mrf.mxu1 }
 0x11a   :  { %v698_v2 = vpack.c.bf16 %v810_v0, %v809_v60  ;;  %v738_v3 = vpack.c.bf16 %v826_v1, %v825_v61 }
 0x11b   :  { %v318_v4 = vpop.f32.mrf.mxu0  ;;  %v382_v5 = vpop.f32.mrf.mxu1 }
 0x11c   :  { %746 = vst [vmem:[#allocation7 + $0x38] sm:$0xff] %v698_v2   ;;  %754 = vst [vmem:[#allocation7 + $0x78] sm:$0xff] %v738_v3   ;;  %v693_v6 = vpack.c.bf16 %v318_v4, %v315_v62  ;;  %v733_v7 = vpack.c.bf16 %v382_v5, %v379_v63 }
 0x11e   :  { %745 = vst [vmem:[#allocation7 + $0x30] sm:$0xff] %v693_v6   ;;  %753 = vst [vmem:[#allocation7 + $0x70] sm:$0xff] %v733_v7  }
 0x11f   :  { %923 = shalt.err (!%p920_p0)
}
 0x120   :  { %565 = dma.vmem_to_hbm [thread:$0]  %s560_s1, 2048, %s978_s2, [#allocation4], %s939_s12, %s939_s12, %s940_s13  }
 0x121   :  { %936 = dma.done.wait [#allocation4], 2048  }
 0x122   :  { %937 = vsyncadd [#allocation4], 4294965248 }
 0x123   :  { %569 = vsyncpa [#allocation3], 1 }
 0x124   :  { %570 = vsyncpa [#allocation6], 1 }
 0x125   :  { %571 = vsyncpa [#allocation4], 1 }

</bundles_post_ra>
